<compile_context>
chip_gen: v6e
topology: v6e:2x2x1
jax: 0.10.0
libtpu: 0.0.40
codegen_flags: <defaults>
</compile_context>

<pallas_src>
import functools

import jax
import jax.numpy as jnp
from jax.experimental import pallas as pl
from jax.experimental.pallas import tpu as pltpu

EPS = 1e-5


def _round_up(a, b):
    return (a + b - 1) // b * b


@functools.lru_cache(maxsize=None)
def _vmem_budget_bytes():
    """~75% of physical VMEM, capped at 96 MiB (v5e/v6e -> 96 MiB, v7x -> 48 MiB)."""
    cap = 64 * 1024 * 1024
    try:
        cap = int(getattr(pltpu.get_tpu_info(), "vmem_capacity_bytes", cap))
    except Exception:  # older jax / interpret mode / non-TPU backend
        pass
    return min(cap * 3 // 4, 96 * 1024 * 1024)


# ---------------------------------------------------------------------------
# Pass 1: GEMM (bf16 operands, f32 scratch accumulator) + BN partial stats.
# ---------------------------------------------------------------------------
def _gemm_stats_kernel(p_ref, w_ref, y_ref, sum_ref, sq_ref, acc_ref,
                       *, tk, whole_k_w):
    k = pl.program_id(2)
    nk = pl.num_programs(2)

    @pl.when(k == 0)
    def _():
        acc_ref[...] = jnp.zeros_like(acc_ref)

    if whole_k_w:
        # Whole-K weight block is resident (DMA'd once); slice the K chunk.
        w = w_ref[pl.ds(pl.multiple_of(k * tk, tk), tk), :]
    else:
        w = w_ref[...]
    acc_ref[...] += jnp.dot(p_ref[...], w, preferred_element_type=jnp.float32)

    @pl.when(k == nk - 1)
    def _():
        acc = acc_ref[...]
        # Per-channel partial statistics from the f32 accumulator (exact),
        # then downcast the conv intermediate to bf16 for the HBM round trip.
        sum_ref[...] = jnp.sum(acc, axis=0, keepdims=True)[None]
        sq_ref[...] = jnp.sum(acc * acc, axis=0, keepdims=True)[None]
        y_ref[...] = acc.astype(y_ref.dtype)


# ---------------------------------------------------------------------------
# Pass 2: folded BatchNorm affine (scale/shift) + ReLU.
# ---------------------------------------------------------------------------
def _bn_relu_flat_kernel(y_ref, scale_ref, shift_ref, o_ref):
    o_ref[...] = jnp.maximum(
        y_ref[...].astype(jnp.float32) * scale_ref[...] + shift_ref[...], 0.0)


def _bn_relu_nchw_kernel(y_ref, scale_ref, shift_ref, o_ref, *, cout):
    act = jnp.maximum(
        y_ref[...].astype(jnp.float32) * scale_ref[...] + shift_ref[...], 0.0)
    # (HW, Cpad) -> (Cpad, HW) on the XLU (pass 2 is mem-bound; XLU slot is
    # free), crop the channel padding, write an NCHW-shaped (1, Cout, HW) block.
    o_ref[...] = jnp.transpose(act, (1, 0))[:cout][None]


# ---------------------------------------------------------------------------
# im2col in NHWC, Cin minor, built directly in bf16.
# ---------------------------------------------------------------------------
def _im2col_nhwc(x, kh, kw, stride, padding, dilation):
    n, cin, h, w = x.shape
    hout = (h + 2 * padding - dilation * (kh - 1) - 1) // stride + 1
    wout = (w + 2 * padding - dilation * (kw - 1) - 1) // stride + 1
    x_nhwc = jnp.transpose(x, (0, 2, 3, 1)).astype(jnp.bfloat16)
    xp = jnp.pad(x_nhwc, ((0, 0), (padding, padding), (padding, padding), (0, 0)))
    cols = []
    for di in range(kh):
        for dj in range(kw):
            oi, oj = di * dilation, dj * dilation
            cols.append(xp[:, oi:oi + stride * hout:stride,
                           oj:oj + stride * wout:stride, :])
    # (N, Hout, Wout, kh*kw, Cin) -> (M, kh*kw*Cin); layout-preserving reshape.
    patches = jnp.stack(cols, axis=3).reshape(n * hout * wout, kh * kw * cin)
    return patches, hout, wout


@functools.partial(jax.jit, static_argnames=("stride", "padding", "dilation",
                                             "block_m", "block_n", "block_k",
                                             "force_stream_weights"))
def bn_conv2d(x, weight, gamma, beta, *, stride=1, padding=1, dilation=1,
              block_m=1024, block_n=512, block_k=1024,
              force_stream_weights=False):
    """Forward of BN_Conv2d (groups=1, bias=False). x: (N, Cin, H, W) NCHW."""
    n, cin, _, _ = x.shape
    cout, _, kh, kw = weight.shape
    budget = _vmem_budget_bytes()

    patches, hout, wout = _im2col_nhwc(x, kh, kw, stride, padding, dilation)
    m, k = patches.shape
    hw = hout * wout

    # ---- Cout (lane) tiling: 256-aligned for the 2x256x256 MXU --------------
    if cout <= 128:
        c_pad, tn = 128, 128
    else:
        c_pad = _round_up(cout, 256)
        tn = 512 if (block_n >= 512 and c_pad % 512 == 0) else 256
    n_j = c_pad // tn

    # ---- K tiling (multiple of 256 when K is large) --------------------------
    k_align = 256 if k >= 256 else 128
    tk = min(_round_up(block_k, k_align), _round_up(k, k_align))
    k_pad = _round_up(k, tk)
    n_k = k_pad // tk

    # ---- M tiling ------------------------------------------------------------
    tm = min(_round_up(block_m, 16), _round_up(m, 16))
    m_pad = _round_up(m, tm)
    n_m = m_pad // tm
    # Megacore (v7x): keep >= 2 parallel tiles whenever the problem allows.
    while n_m * n_j < 2 and tm >= 256:
        tm = _round_up(tm // 2, 16)
        m_pad = _round_up(m, tm)
        n_m = m_pad // tm

    # Keep the weight slab resident in VMEM (DMA'd exactly once) when it fits.
    whole_k_w = (not force_stream_weights) and (2 * k_pad * tn * 2 <= budget // 3)

    def _pass1_footprint(tm_):
        f = 2 * tm_ * tk * 2                            # patches (bf16, 2-buf)
        f += 2 * (k_pad if whole_k_w else tk) * tn * 2  # weights (bf16, 2-buf)
        f += 2 * tm_ * tn * 2                           # y out (bf16, 2-buf)
        f += 4 * 2 * tn * 4                             # stats blocks
        f += tm_ * tn * 4                               # f32 accumulator scratch
        return f

    while _pass1_footprint(tm) > budget and tm > 64:
        tm = max(64, _round_up(tm // 2, 16))
        m_pad = _round_up(m, tm)
        n_m = m_pad // tm

    # ---- GEMM operands (bf16, padded lane-dense) -----------------------------
    patches_p = jnp.pad(patches, ((0, m_pad - m), (0, k_pad - k)))
    w_mat = weight.transpose(2, 3, 1, 0).reshape(k, cout)   # K ordered (kh,kw,cin)
    w_p = jnp.pad(w_mat.astype(jnp.bfloat16), ((0, k_pad - k), (0, c_pad - cout)))
    gamma_p = jnp.pad(gamma.astype(jnp.float32), (0, c_pad - cout))
    beta_p = jnp.pad(beta.astype(jnp.float32), (0, c_pad - cout))

    if whole_k_w:
        w_spec = pl.BlockSpec((k_pad, tn), lambda j, i, kk: (0, j))
        p_spec = pl.BlockSpec((tm, tk), lambda j, i, kk: (i, kk))
    else:
        # Serpentine K order: the boundary W block is reused across M tiles.
        def _keff(i, kk):
            return kk + (i % 2) * (n_k - 1 - 2 * kk)
        w_spec = pl.BlockSpec((tk, tn), lambda j, i, kk: (_keff(i, kk), j))
        p_spec = pl.BlockSpec((tm, tk), lambda j, i, kk: (i, _keff(i, kk)))

    cost1 = pl.CostEstimate(
        flops=2 * m_pad * k_pad * c_pad,
        transcendentals=0,
        bytes_accessed=(n_j * m_pad * k_pad * 2
                        + (1 if whole_k_w else n_m) * k_pad * c_pad * 2
                        + m_pad * c_pad * 2 + 2 * n_m * c_pad * 4))

    y, sums, sqs = pl.pallas_call(
        functools.partial(_gemm_stats_kernel, tk=tk, whole_k_w=whole_k_w),
        out_shape=(
            jax.ShapeDtypeStruct((m_pad, c_pad), jnp.bfloat16),  # conv out (bf16)
            jax.ShapeDtypeStruct((n_m, 1, c_pad), jnp.float32),  # per-tile sum
            jax.ShapeDtypeStruct((n_m, 1, c_pad), jnp.float32),  # per-tile sumsq
        ),
        grid=(n_j, n_m, n_k),
        in_specs=[p_spec, w_spec],
        out_specs=(
            pl.BlockSpec((tm, tn), lambda j, i, kk: (i, j)),
            pl.BlockSpec((1, 1, tn), lambda j, i, kk: (i, 0, j)),
            pl.BlockSpec((1, 1, tn), lambda j, i, kk: (i, 0, j)),
        ),
        scratch_shapes=[pltpu.VMEM((tm, tn), jnp.float32)],
        compiler_params=pltpu.CompilerParams(
            dimension_semantics=("parallel", "parallel", "arbitrary"),
            vmem_limit_bytes=budget),
        cost_estimate=cost1,
    )(patches_p, w_p)

    # ---- fold global BN statistics into a single scale/shift (O(C), f32) ----
    total = jnp.float32(m)                  # zero-padded rows contribute nothing
    ch_sum = jnp.sum(sums, axis=(0, 1))
    ch_sq = jnp.sum(sqs, axis=(0, 1))
    mean = ch_sum / total
    var = jnp.maximum(ch_sq / total - mean * mean, 0.0)       # biased variance
    inv_std = jax.lax.rsqrt(var + EPS)
    scale = (gamma_p * inv_std).reshape(1, c_pad)
    shift = (beta_p - mean * gamma_p * inv_std).reshape(1, c_pad)

    # ---- Pass 2: folded BN + ReLU epilogue -----------------------------------
    fused_nchw = (hw % 128 == 0
                  and 2 * hw * c_pad * 2 + 2 * cout * hw * 4 + c_pad * 16 <= budget)
    cost2 = pl.CostEstimate(
        flops=3 * m_pad * c_pad, transcendentals=0,
        bytes_accessed=(m_pad * c_pad * 2
                        + m_pad * (cout if fused_nchw else c_pad) * 4))

    if fused_nchw:
        # In-kernel transpose: write NCHW-shaped blocks directly (no XLA
        # crop/reshape/transpose pass over the full output tensor).
        out3 = pl.pallas_call(
            functools.partial(_bn_relu_nchw_kernel, cout=cout),
            out_shape=jax.ShapeDtypeStruct((n, cout, hw), jnp.float32),
            grid=(n,),
            in_specs=[
                pl.BlockSpec((hw, c_pad), lambda b: (b, 0)),
                pl.BlockSpec((1, c_pad), lambda b: (0, 0)),
                pl.BlockSpec((1, c_pad), lambda b: (0, 0)),
            ],
            out_specs=pl.BlockSpec((1, cout, hw), lambda b: (b, 0, 0)),
            compiler_params=pltpu.CompilerParams(
                dimension_semantics=("parallel",),
                vmem_limit_bytes=budget),
            cost_estimate=cost2,
        )(y, scale, shift)
        return out3.reshape(n, cout, hout, wout)

    # Generic fallback: flat lane-dense epilogue + XLA crop/reshape/transpose.
    tm2 = tm
    while 12 * tm2 * c_pad > budget and tm2 > 64:
        tm2 = max(64, _round_up(tm2 // 2, 16))
    n_m2 = (m_pad + tm2 - 1) // tm2
    out_flat = pl.pallas_call(
        _bn_relu_flat_kernel,
        out_shape=jax.ShapeDtypeStruct((m_pad, c_pad), jnp.float32),
        grid=(n_m2,),
        in_specs=[
            pl.BlockSpec((tm2, c_pad), lambda i: (i, 0)),
            pl.BlockSpec((1, c_pad), lambda i: (0, 0)),
            pl.BlockSpec((1, c_pad), lambda i: (0, 0)),
        ],
        out_specs=pl.BlockSpec((tm2, c_pad), lambda i: (i, 0)),
        compiler_params=pltpu.CompilerParams(
            dimension_semantics=("parallel",),
            vmem_limit_bytes=budget),
        cost_estimate=cost2,
    )(y, scale, shift)
    out = out_flat[:m, :cout].reshape(n, hout, wout, cout).transpose(0, 3, 1, 2)
    return out


def _reference(x, weight, gamma, beta, *, stride, padding, dilation):
    """Pure-JAX reference: lax conv + training-mode BN + ReLU (all f32)."""
    y = jax.lax.conv_general_dilated(
        x, weight, window_strides=(stride, stride),
        padding=[(padding, padding), (padding, padding)],
        rhs_dilation=(dilation, dilation),
        dimension_numbers=("NCHW", "OIHW", "NCHW"))
    mean = jnp.mean(y, axis=(0, 2, 3), keepdims=True)
    var = jnp.mean((y - mean) ** 2, axis=(0, 2, 3), keepdims=True)  # biased
    y_hat = (y - mean) * jax.lax.rsqrt(var + EPS)
    y_hat = y_hat * gamma.reshape(1, -1, 1, 1) + beta.reshape(1, -1, 1, 1)
    return jnp.maximum(y_hat, 0.0)


def _run_case(name, *, N, CIN, COUT, H, W, KH, stride, padding, dilation, tol,
              **kwargs):
    key = jax.random.PRNGKey(0)
    kx, kw_, kg, kb = jax.random.split(key, 4)
    x = jax.random.normal(kx, (N, CIN, H, W), dtype=jnp.float32)
    weight = 0.1 * jax.random.normal(kw_, (COUT, CIN, KH, KH), dtype=jnp.float32)
    gamma = 1.0 + 0.1 * jax.random.normal(kg, (COUT,), dtype=jnp.float32)
    beta = 0.1 * jax.random.normal(kb, (COUT,), dtype=jnp.float32)

    out = bn_conv2d(x, weight, gamma, beta, stride=stride, padding=padding,
                    dilation=dilation, **kwargs)
    out = jax.block_until_ready(out)
    ref = _reference(x, weight, gamma, beta, stride=stride, padding=padding,
                     dilation=dilation)
    assert out.shape == ref.shape, (name, out.shape, ref.shape)
    err = float(jnp.max(jnp.abs(out - ref)))
    # bf16 GEMM operands + bf16 conv intermediate -> relaxed tolerance vs f32 ref.
    assert jnp.allclose(out, ref, atol=tol, rtol=tol), (name, err)


if __name__ == "__main__":
    # BN_Conv2d(4, 8, kernel_size=3, stride=1, padding=1): whole-K resident
    # weights, fused NCHW epilogue, 2 parallel M tiles (megacore path).
    _run_case("small", N=2, CIN=4, COUT=8, H=16, W=16, KH=3,
              stride=1, padding=1, dilation=1, tol=3e-2)
    # Exercises Cout tiling (2 tiles), multi-K accumulation with serpentine
    # streamed weights, strided conv, and the flat epilogue fallback.
    _run_case("tiled", N=2, CIN=16, COUT=384, H=16, W=16, KH=3,
              stride=2, padding=1, dilation=1, tol=6e-2,
              block_m=64, block_n=256, block_k=128, force_stream_weights=True)
    print("KERNEL_OK")
</pallas_src>

<mosaic_0001>
module attributes {stable_mosaic.version = 11 : i64} {
  func.func @_gemm_stats_kernel(%arg0: i32, %arg1: i32, %arg2: i32, %arg3: memref<256x128xbf16, #tpu.memory_space<vmem>>, %arg4: memref<128x128xbf16, #tpu.memory_space<vmem>>, %arg5: memref<256x128xbf16, #tpu.memory_space<vmem>>, %arg6: memref<1x1x128xf32, #tpu.memory_space<vmem>>, %arg7: memref<1x1x128xf32, #tpu.memory_space<vmem>>, %arg8: memref<256x128xf32, #tpu.memory_space<vmem>>) attributes {dimension_semantics = [#tpu.dimension_semantics<parallel>, #tpu.dimension_semantics<parallel>, #tpu.dimension_semantics<arbitrary>], iteration_bounds = array<i64: 1, 2, 1>, scalar_prefetch = 0 : i64, scratch_operands = 1 : i64, tpu.core_type = #tpu.core_type<tc>, window_params = [{transform_indices = @transform_0, window_bounds = array<i64: 256, 128>}, {transform_indices = @transform_1, window_bounds = array<i64: 128, 128>}, {transform_indices = @transform_2, window_bounds = array<i64: 256, 128>}, {transform_indices = @transform_3, window_bounds = array<i64: 1, 1, 128>}, {transform_indices = @transform_4, window_bounds = array<i64: 1, 1, 128>}]} {
    %c0_i32 = arith.constant 0 : i32
    %0 = arith.cmpi eq, %arg2, %c0_i32 : i32
    %1 = arith.extui %0 : i1 to i32
    %c0_i32_0 = arith.constant 0 : i32
    %2 = arith.cmpi ne, %1, %c0_i32_0 : i32
    scf.if %2 {
      %cst_9 = arith.constant 0.000000e+00 : f32
      %15 = vector.broadcast %cst_9 : f32 to vector<256x128xf32>
      %c0_10 = arith.constant 0 : index
      %c0_11 = arith.constant 0 : index
      %16 = vector.load %arg8[%c0_10, %c0_11] : memref<256x128xf32, #tpu.memory_space<vmem>>, vector<256x128xf32>
      tpu.vector_store %arg8[%c0_10, %c0_11], %15 {strides = array<i32>} : memref<256x128xf32, #tpu.memory_space<vmem>>, vector<256x128xf32>,
    } else {
    }
    %c128_i32 = arith.constant 128 : i32
    %3 = arith.muli %arg2, %c128_i32 : i32
    %4 = tpu.assume_multiple %3, 128 : i32
    %5 = arith.index_cast %4 : i32 to index
    %c0 = arith.constant 0 : index
    %6 = vector.load %arg4[%5, %c0] : memref<128x128xbf16, #tpu.memory_space<vmem>>, vector<128x128xbf16>
    %c0_1 = arith.constant 0 : index
    %c0_2 = arith.constant 0 : index
    %7 = vector.load %arg8[%c0_1, %c0_2] : memref<256x128xf32, #tpu.memory_space<vmem>>, vector<256x128xf32>
    %c0_3 = arith.constant 0 : index
    %c0_4 = arith.constant 0 : index
    %8 = vector.load %arg3[%c0_3, %c0_4] : memref<256x128xbf16, #tpu.memory_space<vmem>>, vector<256x128xbf16>
    %cst = arith.constant dense<0.000000e+00> : vector<256x128xf32>
    %9 = tpu.matmul %8, %6, %cst {dimension_numbers = #tpu.dot_dimension_numbers<[1], [0], [0], [1], [0, 0, 1, 1], [], []>} : vector<256x128xbf16>, vector<128x128xbf16>, vector<256x128xf32> -> vector<256x128xf32>
    %10 = arith.addf %7, %9 : vector<256x128xf32>
    %c0_5 = arith.constant 0 : index
    %c0_6 = arith.constant 0 : index
    %11 = vector.load %arg8[%c0_5, %c0_6] : memref<256x128xf32, #tpu.memory_space<vmem>>, vector<256x128xf32>
    tpu.vector_store %arg8[%c0_5, %c0_6], %10 {strides = array<i32>} : memref<256x128xf32, #tpu.memory_space<vmem>>, vector<256x128xf32>,
    %c0_i32_7 = arith.constant 0 : i32
    %12 = arith.cmpi eq, %arg2, %c0_i32_7 : i32
    %13 = arith.extui %12 : i1 to i32
    %c0_i32_8 = arith.constant 0 : i32
    %14 = arith.cmpi ne, %13, %c0_i32_8 : i32
    scf.if %14 {
      %c0_9 = arith.constant 0 : index
      %c0_10 = arith.constant 0 : index
      %15 = vector.load %arg8[%c0_9, %c0_10] : memref<256x128xf32, #tpu.memory_space<vmem>>, vector<256x128xf32>
      %cst_11 = arith.constant dense<0.000000e+00> : vector<128xf32>
      %16 = vector.multi_reduction <add>, %15, %cst_11 [0] : vector<256x128xf32> to vector<128xf32>
      %17 = vector.shape_cast %16 : vector<128xf32> to vector<1x128xf32>
      %18 = vector.shape_cast %17 : vector<1x128xf32> to vector<1x1x128xf32>
      %c0_12 = arith.constant 0 : index
      %c0_13 = arith.constant 0 : index
      %c0_14 = arith.constant 0 : index
      %19 = vector.load %arg6[%c0_12, %c0_13, %c0_14] : memref<1x1x128xf32, #tpu.memory_space<vmem>>, vector<1x1x128xf32>
      tpu.vector_store %arg6[%c0_12, %c0_13, %c0_14], %18 {strides = array<i32>} : memref<1x1x128xf32, #tpu.memory_space<vmem>>, vector<1x1x128xf32>,
      %20 = arith.mulf %15, %15 : vector<256x128xf32>
      %cst_15 = arith.constant dense<0.000000e+00> : vector<128xf32>
      %21 = vector.multi_reduction <add>, %20, %cst_15 [0] : vector<256x128xf32> to vector<128xf32>
      %22 = vector.shape_cast %21 : vector<128xf32> to vector<1x128xf32>
      %23 = vector.shape_cast %22 : vector<1x128xf32> to vector<1x1x128xf32>
      %c0_16 = arith.constant 0 : index
      %c0_17 = arith.constant 0 : index
      %c0_18 = arith.constant 0 : index
      %24 = vector.load %arg7[%c0_16, %c0_17, %c0_18] : memref<1x1x128xf32, #tpu.memory_space<vmem>>, vector<1x1x128xf32>
      tpu.vector_store %arg7[%c0_16, %c0_17, %c0_18], %23 {strides = array<i32>} : memref<1x1x128xf32, #tpu.memory_space<vmem>>, vector<1x1x128xf32>,
      %25 = arith.truncf %15 : vector<256x128xf32> to vector<256x128xbf16>
      %c0_19 = arith.constant 0 : index
      %c0_20 = arith.constant 0 : index
      %26 = vector.load %arg5[%c0_19, %c0_20] : memref<256x128xbf16, #tpu.memory_space<vmem>>, vector<256x128xbf16>
      tpu.vector_store %arg5[%c0_19, %c0_20], %25 {strides = array<i32>} : memref<256x128xbf16, #tpu.memory_space<vmem>>, vector<256x128xbf16>,
    } else {
    }
    return
  }
  func.func @transform_0(%arg0: i32, %arg1: i32, %arg2: i32) -> (i32, i32) {
    %c0_i32 = arith.constant 0 : i32
    return %arg1, %arg2 : i32, i32
  }
  func.func @transform_1(%arg0: i32, %arg1: i32, %arg2: i32) -> (i32, i32) {
    %c0_i32 = arith.constant 0 : i32
    %c0_i32_0 = arith.constant 0 : i32
    return %c0_i32, %arg0 : i32, i32
  }
  func.func @transform_2(%arg0: i32, %arg1: i32, %arg2: i32) -> (i32, i32) {
    %c0_i32 = arith.constant 0 : i32
    return %arg1, %arg0 : i32, i32
  }
  func.func @transform_3(%arg0: i32, %arg1: i32, %arg2: i32) -> (i32, i32, i32) {
    %c0_i32 = arith.constant 0 : i32
    %c0_i32_0 = arith.constant 0 : i32
    return %arg1, %c0_i32, %arg0 : i32, i32, i32
  }
  func.func @transform_4(%arg0: i32, %arg1: i32, %arg2: i32) -> (i32, i32, i32) {
    %c0_i32 = arith.constant 0 : i32
    %c0_i32_0 = arith.constant 0 : i32
    return %arg1, %c0_i32, %arg0 : i32, i32, i32
  }
}

module attributes {stable_mosaic.version = 11 : i64} {
  func.func @_bn_relu_nchw_kernel(%arg0: i32, %arg1: memref<256x128xbf16, #tpu.memory_space<vmem>>, %arg2: memref<1x128xf32, #tpu.memory_space<vmem>>, %arg3: memref<1x128xf32, #tpu.memory_space<vmem>>, %arg4: memref<1x8x256xf32, #tpu.memory_space<vmem>>) attributes {dimension_semantics = [#tpu.dimension_semantics<parallel>], iteration_bounds = array<i64: 2>, scalar_prefetch = 0 : i64, scratch_operands = 0 : i64, tpu.core_type = #tpu.core_type<tc>, window_params = [{transform_indices = @transform_0, window_bounds = array<i64: 256, 128>}, {pipeline_mode = #tpu.pipeline_mode<synchronous>, transform_indices = @transform_1, window_bounds = array<i64: 1, 128>}, {pipeline_mode = #tpu.pipeline_mode<synchronous>, transform_indices = @transform_2, window_bounds = array<i64: 1, 128>}, {transform_indices = @transform_3, window_bounds = array<i64: 1, 8, 256>}]} {
    %c0 = arith.constant 0 : index
    %c0_0 = arith.constant 0 : index
    %0 = vector.load %arg1[%c0, %c0_0] : memref<256x128xbf16, #tpu.memory_space<vmem>>, vector<256x128xbf16>
    %1 = arith.extf %0 : vector<256x128xbf16> to vector<256x128xf32>
    %c0_1 = arith.constant 0 : index
    %c0_2 = arith.constant 0 : index
    %2 = vector.load %arg2[%c0_1, %c0_2] : memref<1x128xf32, #tpu.memory_space<vmem>>, vector<1x128xf32>
    %3 = vector.broadcast %2 : vector<1x128xf32> to vector<256x128xf32>
    %4 = arith.mulf %1, %3 : vector<256x128xf32>
    %c0_3 = arith.constant 0 : index
    %c0_4 = arith.constant 0 : index
    %5 = vector.load %arg3[%c0_3, %c0_4] : memref<1x128xf32, #tpu.memory_space<vmem>>, vector<1x128xf32>
    %6 = vector.broadcast %5 : vector<1x128xf32> to vector<256x128xf32>
    %7 = arith.addf %4, %6 : vector<256x128xf32>
    %cst = arith.constant 0.000000e+00 : f32
    %8 = vector.broadcast %cst : f32 to vector<256x128xf32>
    %9 = arith.maximumf %7, %8 : vector<256x128xf32>
    %10 = tpu.transpose %9, [1, 0] : vector<256x128xf32> -> vector<128x256xf32>
    %11 = vector.extract_strided_slice %10 {offsets = [0, 0], sizes = [8, 256], strides = [1, 1]} : vector<128x256xf32> to vector<8x256xf32>
    %12 = vector.shape_cast %11 : vector<8x256xf32> to vector<1x8x256xf32>
    %c0_5 = arith.constant 0 : index
    %c0_6 = arith.constant 0 : index
    %c0_7 = arith.constant 0 : index
    %13 = vector.load %arg4[%c0_5, %c0_6, %c0_7] : memref<1x8x256xf32, #tpu.memory_space<vmem>>, vector<1x8x256xf32>
    tpu.vector_store %arg4[%c0_5, %c0_6, %c0_7], %12 {strides = array<i32>} : memref<1x8x256xf32, #tpu.memory_space<vmem>>, vector<1x8x256xf32>,
    return
  }
  func.func @transform_0(%arg0: i32) -> (i32, i32) {
    %c0_i32 = arith.constant 0 : i32
    %c0_i32_0 = arith.constant 0 : i32
    return %arg0, %c0_i32 : i32, i32
  }
  func.func @transform_1(%arg0: i32) -> (i32, i32) {
    %c0_i32 = arith.constant 0 : i32
    %c0_i32_0 = arith.constant 0 : i32
    %c0_i32_1 = arith.constant 0 : i32
    return %c0_i32, %c0_i32_0 : i32, i32
  }
  func.func @transform_2(%arg0: i32) -> (i32, i32) {
    %c0_i32 = arith.constant 0 : i32
    %c0_i32_0 = arith.constant 0 : i32
    %c0_i32_1 = arith.constant 0 : i32
    return %c0_i32, %c0_i32_0 : i32, i32
  }
  func.func @transform_3(%arg0: i32) -> (i32, i32, i32) {
    %c0_i32 = arith.constant 0 : i32
    %c0_i32_0 = arith.constant 0 : i32
    %c0_i32_1 = arith.constant 0 : i32
    return %arg0, %c0_i32, %c0_i32_0 : i32, i32, i32
  }
}

</mosaic_0001>

<bundles_post_ra>
// kernel: bn_conv2d.3
= control target key start
LH: loop header
LB: loop body
LE: loop exit
PB: predicated region body
PF: predicated region fallthrough
CT: control target
= control target key end

     0   :  { %s597_s12 = smov 0   ;;  %s711_s0 = inlined_call_operand.vmem [shape: bf16[512,128], index: 0, kind: input, shape index: {}]   ;;  %s712_s1 = inlined_call_operand.vmem [shape: f32[1,128], index: 1, kind: input, shape index: {}]   ;;  %s713_s2 = inlined_call_operand.vmem [shape: f32[1,128], index: 2, kind: input, shape index: {}]   ;;  %s714_s3 = inlined_call_operand.vmem [shape: f32[2,8,256], index: 3, kind: output, shape index: {}]  }
   0x1 LB: > { %s603_s13 = sadd.s32 4294967295, %s575_s12   ;;  %p472_p0 = scmp.ge.s32.totalorder %s575_s12, 1  ;;  %s575_s12 = sphi %s597_s12, %s13_s12  }
   0x2   : > { %p138_p1 = scmp.lt.s32.totalorder %s575_s12, 3 }
   0x4   : > { %p139_p2 = pnand %p472_p0, %p138_p1 }
   0x5   : > { %s473_s14 = sshll.u32 (!%p139_p2), %s603_s13, 5  ;;  %p168_p4 = scmp.lt.s32.totalorder (!%p139_p2), %s603_s13, 1 }
   0x6   : > { %142 = sbr.rel (%p139_p2) target bundleno = 150 (0x96), region = 32  ;;  %p163_p3 = scmp.lt.s32.totalorder (!%p139_p2), %s473_s14, 63 }
   0xb   : > { %s716_s14 = smov (!%p163_p3, %s473_s14), 63  ;;  %v616_v0 = vld [vmem:[%s712_s1] ss:$0 sm:$0xff]  ;;  %s718_s13 = smov (!%p168_p4, %s603_s13), 1 }
   0xc   : > { %s474_s15 = sshll.u32 %s716_s14, 2  ;;  %v625_v9 = vld [vmem:[%s713_s2] ss:$0 sm:$0xff]  ;;  %s481_s23 = sshll.u32 %s718_s13, 4 }
   0xd   : > { %s611_s18 = scalar_lea.vmem %s711_s0, %s474_s15  ;;  %s172_s26 = scalar_lea.vmem %s714_s3, %s481_s23 }
   0xe   : > { %v553_v1 = vld [vmem:[%s611_s18 + $0x40] sm:$0xff]   ;;  %v554_v3 = vld [vmem:[%s611_s18 + $0x48] sm:$0xff]   ;;  %v555_v24 = vld [vmem:[%s611_s18 + $0x50] sm:$0xff]  }
   0xf   : > { %v483_v2 = vld [vmem:[%s611_s18] sm:$0xff]   ;;  %v516_v4 = vunpack.c.l.bf16 %v553_v1  ;;  %v517_v6 = vunpack.c.h.bf16 %v553_v1  ;;  %v546_v8 = vld [vmem:[%s611_s18 + $0x8] sm:$0xff]   ;;  %v520_v10 = vunpack.c.l.bf16 %v554_v3  ;;  %v521_v18 = vunpack.c.h.bf16 %v554_v3  ;;  %v547_v25 = vld [vmem:[%s611_s18 + $0x10] sm:$0xff]  }
  0x10   : > { %v484_v5 = vunpack.c.l.bf16 %v483_v2  ;;  %v485_v7 = vunpack.c.h.bf16 %v483_v2  ;;  %v488_v11 = vunpack.c.l.bf16 %v546_v8  ;;  %v489_v19 = vunpack.c.h.bf16 %v546_v8  ;;  %v556_v44 = vld [vmem:[%s611_s18 + $0x58] sm:$0xff]   ;;  %v557_v62 = vld [vmem:[%s611_s18 + $0x60] sm:$0xff]  }
  0x11   : > { %v260_v12 = vmul.f32 %v516_v4, %v616_v0  ;;  %v261_v14 = vmul.f32 %v517_v6, %v616_v0  ;;  %v262_v16 = vmul.f32 %v520_v10, %v616_v0  ;;  %v263_v30 = vmul.f32 %v521_v18, %v616_v0  ;;  %v548_v45 = vld [vmem:[%s611_s18 + $0x18] sm:$0xff]   ;;  %v549_v63 = vld [vmem:[%s611_s18 + $0x20] sm:$0xff]   ;;  %v558_v18 = vld [vmem:[%s611_s18 + $0x68] sm:$0xff]  }
  0x12   : > { %v244_v13 = vmul.f32 %v484_v5, %v616_v0  ;;  %v245_v15 = vmul.f32 %v485_v7, %v616_v0  ;;  %v246_v17 = vmul.f32 %v488_v11, %v616_v0  ;;  %v247_v31 = vmul.f32 %v489_v19, %v616_v0  ;;  %v550_v19 = vld [vmem:[%s611_s18 + $0x28] sm:$0xff]  }
  0x13   : > { %v299_v20 = vadd.f32 %v625_v9, %v260_v12  ;;  %v300_v22 = vadd.f32 %v625_v9, %v261_v14  ;;  %v301_v28 = vadd.f32 %v625_v9, %v262_v16  ;;  %v524_v34 = vunpack.c.l.bf16 %v555_v24 }
  0x14   : > { %v283_v21 = vadd.f32 %v625_v9, %v244_v13  ;;  %v284_v23 = vadd.f32 %v625_v9, %v245_v15  ;;  %v285_v29 = vadd.f32 %v625_v9, %v246_v17  ;;  %v492_v35 = vunpack.c.l.bf16 %v547_v25 }
  0x15   : > { %v331_v26 = vmax.f32 %v299_v20, 0.0  ;;  %v332_v32 = vmax.f32 %v300_v22, 0.0  ;;  %v333_v36 = vmax.f32 %v301_v28, 0.0  ;;  %v302_v37 = vadd.f32 %v625_v9, %v263_v30 }
  0x16   : > { %v315_v27 = vmax.f32 %v283_v21, 0.0  ;;  %v316_v33 = vmax.f32 %v284_v23, 0.0  ;;  %v286_v38 = vadd.f32 %v625_v9, %v247_v31  ;;  %v525_v39 = vunpack.c.h.bf16 %v555_v24 }
  0x17   : > { %379 = vxpose.xlu1.b32.start [1/16] (narrow) %v331_v26, 8  ;;  %v317_v40 = vmax.f32 %v285_v29, 0.0  ;;  %v264_v41 = vmul.f32 %v524_v34, %v616_v0  ;;  %v248_v42 = vmul.f32 %v492_v35, %v616_v0  ;;  %v493_v43 = vunpack.c.h.bf16 %v547_v25 }
  0x18   : > { %347 = vxpose.xlu0.b32.start [1/16] (narrow) %v315_v27, 8  ;;  %v334_v46 = vmax.f32 %v302_v37, 0.0  ;;  %v265_v47 = vmul.f32 %v525_v39, %v616_v0  ;;  %v528_v48 = vunpack.c.l.bf16 %v556_v44  ;;  %v496_v49 = vunpack.c.l.bf16 %v548_v45  ;;  %v551_v37 = vld [vmem:[%s611_s18 + $0x30] sm:$0xff]  }
  0x19   : > { %v318_v50 = vmax.f32 %v286_v38, 0.0  ;;  %v303_v51 = vadd.f32 %v625_v9, %v264_v41  ;;  %v287_v52 = vadd.f32 %v625_v9, %v248_v42  ;;  %v249_v53 = vmul.f32 %v493_v43, %v616_v0 }
  0x1a   : > { %v266_v54 = vmul.f32 %v528_v48, %v616_v0  ;;  %v250_v55 = vmul.f32 %v496_v49, %v616_v0  ;;  %v529_v56 = vunpack.c.h.bf16 %v556_v44  ;;  %v497_v57 = vunpack.c.h.bf16 %v548_v45 }
  0x1b   : > { %380 = vxpose.xlu1.b32.cont [2/16] (narrow) %v332_v32, 8  ;;  %v335_v58 = vmax.f32 %v303_v51, 0.0  ;;  %v319_v59 = vmax.f32 %v287_v52, 0.0  ;;  %v304_v60 = vadd.f32 %v625_v9, %v265_v47  ;;  %v288_v61 = vadd.f32 %v625_v9, %v249_v53 }
  0x1c   : > { %348 = vxpose.xlu0.b32.cont [2/16] (narrow) %v316_v33, 8  ;;  %v305_v1 = vadd.f32 %v625_v9, %v266_v54  ;;  %v267_v2 = vmul.f32 %v529_v56, %v616_v0  ;;  %v251_v3 = vmul.f32 %v497_v57, %v616_v0  ;;  %v532_v4 = vunpack.c.l.bf16 %v557_v62  ;;  %v560_v54 = vld [vmem:[%s611_s18 + $0x78] sm:$0xff]  }
  0x1d   : > { %v336_v5 = vmax.f32 %v304_v60, 0.0  ;;  %v320_v6 = vmax.f32 %v288_v61, 0.0  ;;  %v289_v7 = vadd.f32 %v625_v9, %v250_v55  ;;  %v500_v8 = vunpack.c.l.bf16 %v549_v63  ;;  %v552_v55 = vld [vmem:[%s611_s18 + $0x38] sm:$0xff]  }
  0x1e   : > { %v337_v10 = vmax.f32 %v305_v1, 0.0  ;;  %v306_v11 = vadd.f32 %v625_v9, %v267_v2  ;;  %v290_v12 = vadd.f32 %v625_v9, %v251_v3  ;;  %v268_v13 = vmul.f32 %v532_v4, %v616_v0 }
  0x1f   : > { %381 = vxpose.xlu1.b32.cont [3/16] (narrow) %v333_v36, 8  ;;  %v321_v14 = vmax.f32 %v289_v7, 0.0  ;;  %v252_v15 = vmul.f32 %v500_v8, %v616_v0  ;;  %v533_v16 = vunpack.c.h.bf16 %v557_v62  ;;  %v501_v17 = vunpack.c.h.bf16 %v549_v63  ;;  %v559_v36 = vld [vmem:[%s611_s18 + $0x70] sm:$0xff]  }
  0x20   : > { %349 = vxpose.xlu0.b32.cont [3/16] (narrow) %v317_v40, 8  ;;  %v338_v20 = vmax.f32 %v306_v11, 0.0  ;;  %v307_v21 = vadd.f32 %v625_v9, %v268_v13  ;;  %v536_v22 = vunpack.c.l.bf16 %v558_v18  ;;  %v504_v23 = vunpack.c.l.bf16 %v550_v19 }
  0x21   : > { %v322_v24 = vmax.f32 %v290_v12, 0.0  ;;  %v291_v25 = vadd.f32 %v625_v9, %v252_v15  ;;  %v269_v26 = vmul.f32 %v533_v16, %v616_v0  ;;  %v253_v27 = vmul.f32 %v501_v17, %v616_v0 }
  0x22   : > { %v270_v28 = vmul.f32 %v536_v22, %v616_v0  ;;  %v254_v29 = vmul.f32 %v504_v23, %v616_v0  ;;  %v537_v30 = vunpack.c.h.bf16 %v558_v18  ;;  %v505_v31 = vunpack.c.h.bf16 %v550_v19 }
  0x23   : > { %382 = vxpose.xlu1.b32.cont [4/16] (narrow) %v334_v46, 8  ;;  %v339_v32 = vmax.f32 %v307_v21, 0.0  ;;  %v323_v33 = vmax.f32 %v291_v25, 0.0  ;;  %v308_v34 = vadd.f32 %v625_v9, %v269_v26  ;;  %v292_v35 = vadd.f32 %v625_v9, %v253_v27 }
  0x24   : > { %350 = vxpose.xlu0.b32.cont [4/16] (narrow) %v318_v50, 8  ;;  %v309_v38 = vadd.f32 %v625_v9, %v270_v28  ;;  %v271_v39 = vmul.f32 %v537_v30, %v616_v0  ;;  %v255_v40 = vmul.f32 %v505_v31, %v616_v0  ;;  %v540_v41 = vunpack.c.l.bf16 %v559_v36 }
  0x25   : > { %v340_v42 = vmax.f32 %v308_v34, 0.0  ;;  %v324_v43 = vmax.f32 %v292_v35, 0.0  ;;  %v293_v44 = vadd.f32 %v625_v9, %v254_v29  ;;  %v508_v45 = vunpack.c.l.bf16 %v551_v37 }
  0x26   : > { %v341_v46 = vmax.f32 %v309_v38, 0.0  ;;  %v310_v47 = vadd.f32 %v625_v9, %v271_v39  ;;  %v294_v48 = vadd.f32 %v625_v9, %v255_v40  ;;  %v272_v49 = vmul.f32 %v540_v41, %v616_v0 }
  0x27   : > { %383 = vxpose.xlu1.b32.cont [5/16] (narrow) %v335_v58, 8  ;;  %v325_v50 = vmax.f32 %v293_v44, 0.0  ;;  %v256_v51 = vmul.f32 %v508_v45, %v616_v0  ;;  %v541_v52 = vunpack.c.h.bf16 %v559_v36  ;;  %v509_v53 = vunpack.c.h.bf16 %v551_v37 }
  0x28   : > { %351 = vxpose.xlu0.b32.cont [5/16] (narrow) %v319_v59, 8  ;;  %v342_v56 = vmax.f32 %v310_v47, 0.0  ;;  %v311_v57 = vadd.f32 %v625_v9, %v272_v49  ;;  %v544_v58 = vunpack.c.l.bf16 %v560_v54  ;;  %v512_v59 = vunpack.c.l.bf16 %v552_v55 }
  0x29   : > { %v326_v60 = vmax.f32 %v294_v48, 0.0  ;;  %v295_v61 = vadd.f32 %v625_v9, %v256_v51  ;;  %v273_v62 = vmul.f32 %v541_v52, %v616_v0  ;;  %v257_v63 = vmul.f32 %v509_v53, %v616_v0 }
  0x2a   : > { %v274_v1 = vmul.f32 %v544_v58, %v616_v0  ;;  %v258_v2 = vmul.f32 %v512_v59, %v616_v0  ;;  %v545_v3 = vunpack.c.h.bf16 %v560_v54  ;;  %v513_v4 = vunpack.c.h.bf16 %v552_v55 }
  0x2b   : > { %384 = vxpose.xlu1.b32.cont [6/16] (narrow) %v336_v5, 8  ;;  %v343_v5 = vmax.f32 %v311_v57, 0.0  ;;  %v312_v7 = vadd.f32 %v625_v9, %v273_v62  ;;  %v296_v8 = vadd.f32 %v625_v9, %v257_v63 }
  0x2c   : > { %352 = vxpose.xlu0.b32.cont [6/16] (narrow) %v320_v6, 8  ;;  %v327_v6 = vmax.f32 %v295_v61, 0.0  ;;  %v259_v11 = vmul.f32 %v513_v4, %v616_v0  ;;  %v297_v15 = vadd.f32 %v625_v9, %v258_v2 }
  0x2d   : > { %v344_v12 = vmax.f32 %v312_v7, 0.0  ;;  %v328_v13 = vmax.f32 %v296_v8, 0.0 }
  0x2e   : > { %v329_v17 = vmax.f32 %v297_v15, 0.0  ;;  %v298_v19 = vadd.f32 %v625_v9, %v259_v11 }
  0x2f   : > { %385 = vxpose.xlu1.b32.cont [7/16] (narrow) %v337_v10, 8  ;;  %v275_v10 = vmul.f32 %v545_v3, %v616_v0 }
  0x30   : > { %353 = vxpose.xlu0.b32.cont [7/16] (narrow) %v321_v14, 8  ;;  %v313_v14 = vadd.f32 %v625_v9, %v274_v1 }
  0x31   : > { %v314_v18 = vadd.f32 %v625_v9, %v275_v10 }
  0x32   : > { %v345_v16 = vmax.f32 %v313_v14, 0.0 }
  0x33   : > { %386 = vxpose.xlu1.b32.cont [8/16] (narrow) %v338_v20, 8  ;;  %v346_v0 = vmax.f32 %v314_v18, 0.0  ;;  %v330_v20 = vmax.f32 %v298_v19, 0.0 }
  0x34   : > { %354 = vxpose.xlu0.b32.cont [8/16] (narrow) %v322_v24, 8 }
  0x37   : > { %387 = vxpose.xlu1.b32.cont [9/16] (narrow) %v339_v32, 8 }
  0x38   : > { %355 = vxpose.xlu0.b32.cont [9/16] (narrow) %v323_v33, 8 }
  0x3b   : > { %388 = vxpose.xlu1.b32.cont [10/16] (narrow) %v340_v42, 8 }
  0x3c   : > { %356 = vxpose.xlu0.b32.cont [10/16] (narrow) %v324_v43, 8 }
  0x3f   : > { %389 = vxpose.xlu1.b32.cont [11/16] (narrow) %v341_v46, 8 }
  0x40   : > { %357 = vxpose.xlu0.b32.cont [11/16] (narrow) %v325_v50, 8 }
  0x43   : > { %390 = vxpose.xlu1.b32.cont [12/16] (narrow) %v342_v56, 8 }
  0x44   : > { %358 = vxpose.xlu0.b32.cont [12/16] (narrow) %v326_v60, 8 }
  0x47   : > { %391 = vxpose.xlu1.b32.cont [13/16] (narrow) %v343_v5, 8 }
  0x48   : > { %359 = vxpose.xlu0.b32.cont [13/16] (narrow) %v327_v6, 8 }
  0x4b   : > { %392 = vxpose.xlu1.b32.cont [14/16] (narrow) %v344_v12, 8 }
  0x4c   : > { %360 = vxpose.xlu0.b32.cont [14/16] (narrow) %v328_v13, 8 }
  0x4f   : > { %393 = vxpose.xlu1.b32.cont [15/16] (narrow) %v345_v16, 8 }
  0x50   : > { %361 = vxpose.xlu0.b32.cont [15/16] (narrow) %v329_v17, 8 }
  0x53   : > { %394 = vxpose.xlu1.b32.end [16/16] (narrow) %v346_v0, 8 }
  0x54   : > { %362 = vxpose.xlu0.b32.end [16/16] (narrow) %v330_v20, 8 }
  0x93   : > { %v395_v21 = vpop.trf.xlu1 }
  0x94   : > { %v363_v22 = vpop.trf.xlu0  ;;  %412 = vst [vmem:[%s172_s26 + $0x8] sm:$0xff] %v395_v21 }
  0x95   : > { %411 = vst [vmem:[%s172_s26] sm:$0xff] %v363_v22 }
  0x96 PF: > { %s13_s12 = sadd.s32 1, %s575_s12  }
  0x97   : > { %p10_p5 = scmp.ge.s32.totalorder %s13_s12, 4  }
  0x99   :  { %12 = sbr.rel (!%p10_p5) target bundleno = 1 (0x1), region = 62 }

// kernel: bn_conv2d.2
= control target key start
LH: loop header
LB: loop body
LE: loop exit
PB: predicated region body
PF: predicated region fallthrough
CT: control target
= control target key end

     0   :  { %s1631_s15 = smov 0   ;;  %s1633_s16 = smov 0   ;;  %s1832_s0 = inlined_call_operand.vmem [shape: bf16[512,128], index: 0, kind: input, shape index: {}]   ;;  %s1833_s1 = inlined_call_operand.vmem [shape: bf16[128,128], index: 1, kind: input, shape index: {}]   ;;  %s1834_s2 = inlined_call_operand.vmem [shape: bf16[512,128], index: 2, kind: output, shape index: {0}]   ;;  %s1835_s3 = inlined_call_operand.vmem [shape: f32[2,1,128], index: 3, kind: output, shape index: {1}]   ;;  %s1836_s4 = inlined_call_operand.vmem [shape: f32[2,1,128], index: 4, kind: output, shape index: {2}]  }
   0x1   :  { %s1635_s17 = smov 0  }
   0x2 LB: > { %s30_s18 = sadd.s32 1, %s1600_s16  ;;  %p1256_p0 = scmp.ge.s32.totalorder %s1604_s17, 1  ;;  %s1604_s17 = sphi %s1635_s17, %s15_s17   ;;  %s1600_s16 = sphi %s1633_s16, %s1838_s16   ;;  %s1596_s15 = sphi %s1631_s15, %s1837_s15  }
   0x3   : > { %p32_p1 = scmp.ge.s32.totalorder %s30_s18, 2  ;;  %p207_p2 = scmp.lt.s32.totalorder %s1604_s17, 3 }
   0x5   : > { %s1840_s18 = smov (%p32_p1, %s30_s18), 0  ;;  %p208_p3 = pnand %p1256_p0, %p207_p2 }
   0x6   : > { %s1257_s21 = sshll.u32 (!%p208_p3), %s1596_s15, 5  ;;  %p277_p5 = scmp.lt.s32.totalorder (!%p208_p3), %s1596_s15, 1 }
   0x7   : > { %211 = sbr.rel (%p208_p3) target bundleno = 321 (0x141), region = 28  ;;  %p256_p4 = scmp.lt.s32.totalorder (!%p208_p3), %s1257_s21, 63 }
   0xc   : > { %v1558_v0 = vld [vmem:[%s1833_s1 + $0x38] sm:$0xff]   ;;  %v1559_v1 = vld [vmem:[%s1833_s1 + $0x30] sm:$0xff]   ;;  %s1842_s21 = smov (!%p256_p4, %s1257_s21), 63  ;;  %v1560_v2 = vld [vmem:[%s1833_s1 + $0x28] sm:$0xff]   ;;  %s1844_s15 = smov (!%p277_p5, %s1596_s15), 1 }
   0xd   : > { %1470 = vmatprep.subr.bf16.mxu0 %v1558_v0  ;;  %1518 = vmatprep.subr.bf16.mxu1 %v1558_v0  ;;  %s1258_s26 = sshll.u32 %s1842_s21, 2  ;;  %v1561_v3 = vld [vmem:[%s1833_s1 + $0x20] sm:$0xff]   ;;  %v1562_v5 = vld [vmem:[%s1833_s1 + $0x18] sm:$0xff]   ;;  %v1563_v6 = vld [vmem:[%s1833_s1 + $0x10] sm:$0xff]   ;;  %s282_s23 = scalar_lea.vmem %s1835_s3, %s1844_s15 }
   0xe   : > { %1471 = vmatpush3.bf16.msra.mxu0 %v1558_v0  ;;  %1526 = vmatpush3.bf16.msra.mxu1 %v1558_v0  ;;  %s1669_s29 = scalar_lea.vmem %s1832_s0, %s1258_s26  ;;  %v1564_v8 = vld [vmem:[%s1833_s1 + $0x8] sm:$0xff]   ;;  %v1565_v9 = vld [vmem:[%s1833_s1] sm:$0xff]   ;;  %s1711_s20 = scalar_lea.vmem %s1834_s2, %s1258_s26 }
   0xf   : > { %1472 = vmatprep.subr.bf16.mxu0 %v1559_v1  ;;  %1519 = vmatprep.subr.bf16.mxu1 %v1559_v1  ;;  %v1566_v4 = vld [vmem:[%s1669_s29] sm:$0xff]   ;;  %v1567_v10 = vld [vmem:[%s1669_s29 + $0x8] sm:$0xff]   ;;  %v1568_v12 = vld [vmem:[%s1669_s29 + $0x10] sm:$0xff]   ;;  %s288_s26 = scalar_lea.vmem %s1836_s4, %s1844_s15 }
  0x10   : > { %1486 = vmatprep.mubr.bf16.mxu0 %v1566_v4  ;;  %v1574_v7 = vld [vmem:[%s1669_s29 + $0x40] sm:$0xff]   ;;  %v1575_v11 = vld [vmem:[%s1669_s29 + $0x48] sm:$0xff]   ;;  %v1576_v13 = vld [vmem:[%s1669_s29 + $0x50] sm:$0xff]  }
  0x11   : > { %1502 = vmatprep.mubr.bf16.mxu1 %v1574_v7  ;;  %v1569_v14 = vld [vmem:[%s1669_s29 + $0x18] sm:$0xff]   ;;  %v1570_v16 = vld [vmem:[%s1669_s29 + $0x20] sm:$0xff]   ;;  %v1571_v18 = vld [vmem:[%s1669_s29 + $0x28] sm:$0xff]  }
  0x12   : > { %1473 = vmatpush3.bf16.msra.mxu0 %v1559_v1  ;;  %1527 = vmatpush3.bf16.msra.mxu1 %v1559_v1  ;;  %v1577_v15 = vld [vmem:[%s1669_s29 + $0x58] sm:$0xff]   ;;  %v1578_v17 = vld [vmem:[%s1669_s29 + $0x60] sm:$0xff]   ;;  %v1579_v19 = vld [vmem:[%s1669_s29 + $0x68] sm:$0xff]  }
  0x13   : > { %1474 = vmatprep.subr.bf16.mxu0 %v1560_v2  ;;  %1520 = vmatprep.subr.bf16.mxu1 %v1560_v2  ;;  %v1572_v20 = vld [vmem:[%s1669_s29 + $0x30] sm:$0xff]   ;;  %v1573_v22 = vld [vmem:[%s1669_s29 + $0x38] sm:$0xff]  }
  0x14   : > { %v1580_v21 = vld [vmem:[%s1669_s29 + $0x70] sm:$0xff]   ;;  %v1581_v23 = vld [vmem:[%s1669_s29 + $0x78] sm:$0xff]  }
  0x16   : > { %1475 = vmatpush3.bf16.msra.mxu0 %v1560_v2  ;;  %1528 = vmatpush3.bf16.msra.mxu1 %v1560_v2 }
  0x17   : > { %1476 = vmatprep.subr.bf16.mxu0 %v1561_v3  ;;  %1521 = vmatprep.subr.bf16.mxu1 %v1561_v3 }
  0x1a   : > { %1477 = vmatpush3.bf16.msra.mxu0 %v1561_v3  ;;  %1529 = vmatpush3.bf16.msra.mxu1 %v1561_v3 }
  0x1b   : > { %1478 = vmatprep.subr.bf16.mxu0 %v1562_v5  ;;  %1522 = vmatprep.subr.bf16.mxu1 %v1562_v5 }
  0x1e   : > { %1479 = vmatpush3.bf16.msra.mxu0 %v1562_v5  ;;  %1530 = vmatpush3.bf16.msra.mxu1 %v1562_v5 }
  0x1f   : > { %1480 = vmatprep.subr.bf16.mxu0 %v1563_v6  ;;  %1523 = vmatprep.subr.bf16.mxu1 %v1563_v6 }
  0x22   : > { %1481 = vmatpush3.bf16.msra.mxu0 %v1563_v6  ;;  %1531 = vmatpush3.bf16.msra.mxu1 %v1563_v6 }
  0x23   : > { %1482 = vmatprep.subr.bf16.mxu0 %v1564_v8  ;;  %1524 = vmatprep.subr.bf16.mxu1 %v1564_v8 }
  0x26   : > { %1483 = vmatpush3.bf16.msra.mxu0 %v1564_v8  ;;  %1532 = vmatpush3.bf16.msra.mxu1 %v1564_v8 }
  0x27   : > { %1484 = vmatprep.subr.bf16.mxu0 %v1565_v9  ;;  %1525 = vmatprep.subr.bf16.mxu1 %v1565_v9 }
  0x2a   : > { %1485 = vmatpush3.bf16.msra.mxu0 %v1565_v9  ;;  %1533 = vmatpush3.bf16.msra.mxu1 %v1565_v9 }
  0x2d   : > { %1487 = vmatmul.mubr.bf16.vlgmr.msra.gmra.mxu0 %v1567_v10  ;;  %1503 = vmatmul.mubr.bf16.vlgmr.msra.gmra.mxu1 %v1575_v11 }
  0x2e   : > { %1490 = vmatprep.mubr.bf16.mxu0 %v1568_v12  ;;  %1506 = vmatprep.mubr.bf16.mxu1 %v1576_v13 }
  0x35   : > { %1491 = vmatmul.mubr.bf16.gmra.mxu0 %v1569_v14  ;;  %1507 = vmatmul.mubr.bf16.gmra.mxu1 %v1577_v15 }
  0x36   : > { %1494 = vmatprep.mubr.bf16.mxu0 %v1570_v16  ;;  %1510 = vmatprep.mubr.bf16.mxu1 %v1578_v17 }
  0x3d   : > { %1495 = vmatmul.mubr.bf16.gmra.mxu0 %v1571_v18  ;;  %1511 = vmatmul.mubr.bf16.gmra.mxu1 %v1579_v19 }
  0x3e   : > { %1498 = vmatprep.mubr.bf16.mxu0 %v1572_v20  ;;  %1514 = vmatprep.mubr.bf16.mxu1 %v1580_v21 }
  0x45   : > { %1499 = vmatmul.mubr.bf16.gmra.mxu0 %v1573_v22  ;;  %1515 = vmatmul.mubr.bf16.gmra.mxu1 %v1581_v23 }
  0xed   : > { %v1488_v24 = vpop.f32.mrf.mxu0  ;;  %v1702_v25 = vpop.f32.mrf.mxu1 }
  0xee   : > { %v855_v41 = vmul.f32 %v1488_v24, %v1488_v24 }
  0xef   : > { %v589_v26 = vpop.f32.mrf.mxu0  ;;  %v1704_v27 = vpop.f32.mrf.mxu1 }
  0xf0   : > { %v853_v34 = vmul.f32 %v589_v26, %v589_v26 }
  0xf1   : > { %v1489_v28 = vpop.f32.mrf.mxu0  ;;  %v1713_v29 = vpop.f32.mrf.mxu1 }
  0xf2   : > { %v1359_v30 = vpack.c.bf16 %v1489_v28, %v1488_v24  ;;  %v1399_v31 = vpack.c.bf16 %v1713_v29, %v1702_v25  ;;  %v856_v46 = vmul.f32 %v1489_v28, %v1489_v28 }
  0xf3   : > { %v592_v32 = vpop.f32.mrf.mxu0  ;;  %v1717_v33 = vpop.f32.mrf.mxu1 }
  0xf4   : > { %1431 = vst [vmem:[%s1711_s20 + $0x8] sm:$0xff] %v1359_v30   ;;  %v815_v35 = vadd.f32 %v592_v32, %v589_v26  ;;  %v854_v36 = vmul.f32 %v592_v32, %v592_v32  ;;  %v1354_v37 = vpack.c.bf16 %v592_v32, %v589_v26  ;;  %1439 = vst [vmem:[%s1711_s20 + $0x48] sm:$0xff] %v1399_v31  }
  0xf5   : > { %v1492_v38 = vpop.f32.mrf.mxu0  ;;  %v1394_v39 = vpack.c.bf16 %v1717_v33, %v1704_v27  ;;  %v1723_v40 = vpop.f32.mrf.mxu1 }
  0xf6   : > { %v816_v42 = vadd.f32 %v1488_v24, %v815_v35  ;;  %v885_v43 = vadd.f32 %v854_v36, %v853_v34  ;;  %1355 = vst [vmem:[%s1711_s20] sm:$0xff] %v1354_v37   ;;  %v859_v1 = vmul.f32 %v1492_v38, %v1492_v38 }
  0xf7   : > { %v605_v44 = vpop.f32.mrf.mxu0  ;;  %1438 = vst [vmem:[%s1711_s20 + $0x40] sm:$0xff] %v1394_v39   ;;  %v1727_v45 = vpop.f32.mrf.mxu1 }
  0xf8   : > { %v886_v47 = vadd.f32 %v885_v43, %v855_v41  ;;  %v817_v48 = vadd.f32 %v1489_v28, %v816_v42  ;;  %v857_v52 = vmul.f32 %v605_v44, %v605_v44 }
  0xf9   : > { %v1493_v49 = vpop.f32.mrf.mxu0  ;;  %v1729_v50 = vpop.f32.mrf.mxu1 }
  0xfa   : > { %v818_v51 = vadd.f32 %v817_v48, %v605_v44  ;;  %v887_v53 = vadd.f32 %v886_v47, %v856_v46  ;;  %v1369_v54 = vpack.c.bf16 %v1493_v49, %v1492_v38  ;;  %v1409_v56 = vpack.c.bf16 %v1729_v50, %v1723_v40 }
  0xfb   : > { %v608_v55 = vpop.f32.mrf.mxu0  ;;  %v1733_v57 = vpop.f32.mrf.mxu1  ;;  %v860_v6 = vmul.f32 %v1493_v49, %v1493_v49 }
  0xfc   : > { %v888_v58 = vadd.f32 %v887_v53, %v857_v52  ;;  %1433 = vst [vmem:[%s1711_s20 + $0x18] sm:$0xff] %v1369_v54   ;;  %v819_v59 = vadd.f32 %v818_v51, %v608_v55  ;;  %v858_v60 = vmul.f32 %v608_v55, %v608_v55  ;;  %v1364_v61 = vpack.c.bf16 %v608_v55, %v605_v44 }
  0xfd   : > { %v1496_v62 = vpop.f32.mrf.mxu0  ;;  %1441 = vst [vmem:[%s1711_s20 + $0x58] sm:$0xff] %v1409_v56   ;;  %v1404_v63 = vpack.c.bf16 %v1733_v57, %v1727_v45  ;;  %v1739_v0 = vpop.f32.mrf.mxu1 }
  0xfe   : > { %v820_v2 = vadd.f32 %v1492_v38, %v819_v59  ;;  %v889_v3 = vadd.f32 %v888_v58, %v858_v60  ;;  %1432 = vst [vmem:[%s1711_s20 + $0x10] sm:$0xff] %v1364_v61   ;;  %v863_v26 = vmul.f32 %v1496_v62, %v1496_v62  ;;  %v869_v61 = vmul.f32 %v1704_v27, %v1704_v27 }
  0xff   : > { %v621_v4 = vpop.f32.mrf.mxu0  ;;  %1440 = vst [vmem:[%s1711_s20 + $0x50] sm:$0xff] %v1404_v63   ;;  %v1743_v5 = vpop.f32.mrf.mxu1 }
 0x100   : > { %v890_v7 = vadd.f32 %v889_v3, %v859_v1  ;;  %v821_v8 = vadd.f32 %v1493_v49, %v820_v2  ;;  %v861_v12 = vmul.f32 %v621_v4, %v621_v4  ;;  %v870_v2 = vmul.f32 %v1717_v33, %v1717_v33 }
 0x101   : > { %v1497_v9 = vpop.f32.mrf.mxu0  ;;  %v1745_v10 = vpop.f32.mrf.mxu1 }
 0x102   : > { %v822_v11 = vadd.f32 %v821_v8, %v621_v4  ;;  %v891_v13 = vadd.f32 %v890_v7, %v860_v6  ;;  %v1379_v14 = vpack.c.bf16 %v1497_v9, %v1496_v62  ;;  %v1419_v16 = vpack.c.bf16 %v1745_v10, %v1739_v0 }
 0x103   : > { %v624_v15 = vpop.f32.mrf.mxu0  ;;  %v1749_v17 = vpop.f32.mrf.mxu1  ;;  %v864_v34 = vmul.f32 %v1497_v9, %v1497_v9  ;;  %v872_v8 = vmul.f32 %v1713_v29, %v1713_v29 }
 0x104   : > { %v892_v18 = vadd.f32 %v891_v13, %v861_v12  ;;  %1435 = vst [vmem:[%s1711_s20 + $0x28] sm:$0xff] %v1379_v14   ;;  %v823_v19 = vadd.f32 %v822_v11, %v624_v15  ;;  %v862_v20 = vmul.f32 %v624_v15, %v624_v15  ;;  %v1374_v21 = vpack.c.bf16 %v624_v15, %v621_v4 }
 0x105   : > { %v1500_v22 = vpop.f32.mrf.mxu0  ;;  %1443 = vst [vmem:[%s1711_s20 + $0x68] sm:$0xff] %v1419_v16   ;;  %v1414_v23 = vpack.c.bf16 %v1749_v17, %v1743_v5  ;;  %v1755_v24 = vpop.f32.mrf.mxu1  ;;  %v871_v4 = vmul.f32 %v1702_v25, %v1702_v25  ;;  %v873_v12 = vmul.f32 %v1727_v45, %v1727_v45  ;;  %v874_v15 = vmul.f32 %v1733_v57, %v1733_v57 }
 0x106   : > { %v824_v28 = vadd.f32 %v1496_v62, %v823_v19  ;;  %v893_v30 = vadd.f32 %v892_v18, %v862_v20  ;;  %1434 = vst [vmem:[%s1711_s20 + $0x20] sm:$0xff] %v1374_v21   ;;  %v867_v54 = vmul.f32 %v1500_v22, %v1500_v22  ;;  %v877_v21 = vmul.f32 %v1743_v5, %v1743_v5 }
 0x107   : > { %v637_v31 = vpop.f32.mrf.mxu0  ;;  %1442 = vst [vmem:[%s1711_s20 + $0x60] sm:$0xff] %v1414_v23   ;;  %v1759_v32 = vpop.f32.mrf.mxu1 }
 0x108   : > { %v894_v35 = vadd.f32 %v893_v30, %v863_v26  ;;  %v825_v36 = vadd.f32 %v1497_v9, %v824_v28  ;;  %v865_v41 = vmul.f32 %v637_v31, %v637_v31  ;;  %v878_v26 = vmul.f32 %v1749_v17, %v1749_v17 }
 0x109   : > { %v1501_v37 = vpop.f32.mrf.mxu0  ;;  %v1761_v38 = vpop.f32.mrf.mxu1 }
 0x10a   : > { %v826_v39 = vadd.f32 %v825_v36, %v637_v31  ;;  %v895_v42 = vadd.f32 %v894_v35, %v864_v34  ;;  %v1389_v43 = vpack.c.bf16 %v1501_v37, %v1500_v22  ;;  %v1429_v46 = vpack.c.bf16 %v1761_v38, %v1755_v24 }
 0x10b   : > { %v640_v44 = vpop.f32.mrf.mxu0  ;;  %v704_v47 = vpop.f32.mrf.mxu1  ;;  %v868_v58 = vmul.f32 %v1501_v37, %v1501_v37  ;;  %v881_v35 = vmul.f32 %v1759_v32, %v1759_v32 }
 0x10c   : > { %v896_v48 = vadd.f32 %v895_v42, %v865_v41  ;;  %1437 = vst [vmem:[%s1711_s20 + $0x38] sm:$0xff] %v1389_v43   ;;  %v827_v49 = vadd.f32 %v826_v39, %v640_v44  ;;  %v866_v51 = vmul.f32 %v640_v44, %v640_v44  ;;  %v1384_v52 = vpack.c.bf16 %v640_v44, %v637_v31 }
 0x10d   : > { %1445 = vst [vmem:[%s1711_s20 + $0x78] sm:$0xff] %v1429_v46   ;;  %v1424_v53 = vpack.c.bf16 %v704_v47, %v1759_v32  ;;  %v882_v39 = vmul.f32 %v704_v47, %v704_v47  ;;  %v884_v43 = vmul.f32 %v1761_v38, %v1761_v38 }
 0x10e   : > { %v828_v55 = vadd.f32 %v1500_v22, %v827_v49  ;;  %v897_v56 = vadd.f32 %v896_v48, %v866_v51  ;;  %1436 = vst [vmem:[%s1711_s20 + $0x30] sm:$0xff] %v1384_v52  }
 0x10f   : > { %1444 = vst [vmem:[%s1711_s20 + $0x70] sm:$0xff] %v1424_v53  }
 0x110   : > { %v829_v59 = vadd.f32 %v1501_v37, %v828_v55  ;;  %v898_v60 = vadd.f32 %v897_v56, %v867_v54 }
 0x112   : > { %v899_v62 = vadd.f32 %v898_v60, %v868_v58  ;;  %v830_v63 = vadd.f32 %v829_v59, %v1704_v27 }
 0x114   : > { %v831_v1 = vadd.f32 %v830_v63, %v1717_v33  ;;  %v900_v3 = vadd.f32 %v899_v62, %v869_v61 }
 0x116   : > { %v832_v6 = vadd.f32 %v1702_v25, %v831_v1  ;;  %v901_v7 = vadd.f32 %v900_v3, %v870_v2  ;;  %v875_v25 = vmul.f32 %v1723_v40, %v1723_v40 }
 0x118   : > { %v902_v9 = vadd.f32 %v901_v7, %v871_v4  ;;  %v833_v11 = vadd.f32 %v1713_v29, %v832_v6  ;;  %v876_v29 = vmul.f32 %v1729_v50, %v1729_v50 }
 0x11a   : > { %v834_v27 = vadd.f32 %v833_v11, %v1727_v45  ;;  %v903_v13 = vadd.f32 %v902_v9, %v872_v8 }
 0x11c   : > { %v904_v33 = vadd.f32 %v903_v13, %v873_v12  ;;  %v835_v14 = vadd.f32 %v834_v27, %v1733_v57 }
 0x11e   : > { %v836_v16 = vadd.f32 %v1723_v40, %v835_v14  ;;  %v905_v18 = vadd.f32 %v904_v33, %v874_v15  ;;  %v879_v40 = vmul.f32 %v1739_v0, %v1739_v0 }
 0x120   : > { %v906_v19 = vadd.f32 %v905_v18, %v875_v25  ;;  %v837_v20 = vadd.f32 %v1729_v50, %v836_v16  ;;  %v880_v50 = vmul.f32 %v1745_v10, %v1745_v10 }
 0x122   : > { %v838_v45 = vadd.f32 %v837_v20, %v1743_v5  ;;  %v907_v22 = vadd.f32 %v906_v19, %v876_v29 }
 0x124   : > { %v908_v23 = vadd.f32 %v907_v22, %v877_v21  ;;  %v839_v57 = vadd.f32 %v838_v45, %v1749_v17 }
 0x126   : > { %v840_v28 = vadd.f32 %v1739_v0, %v839_v57  ;;  %v909_v30 = vadd.f32 %v908_v23, %v878_v26  ;;  %v883_v0 = vmul.f32 %v1755_v24, %v1755_v24 }
 0x128   : > { %v910_v31 = vadd.f32 %v909_v30, %v879_v40  ;;  %v841_v5 = vadd.f32 %v1745_v10, %v840_v28 }
 0x12a   : > { %v842_v34 = vadd.f32 %v841_v5, %v1759_v32  ;;  %v911_v36 = vadd.f32 %v910_v31, %v880_v50 }
 0x12c   : > { %v912_v17 = vadd.f32 %v911_v36, %v881_v35  ;;  %v843_v37 = vadd.f32 %v842_v34, %v704_v47 }
 0x12e   : > { %v844_v41 = vadd.f32 %v1755_v24, %v843_v37  ;;  %v913_v42 = vadd.f32 %v912_v17, %v882_v39 }
 0x130   : > { %v845_v10 = vadd.f32 %v1761_v38, %v844_v41  ;;  %v914_v44 = vadd.f32 %v913_v42, %v883_v0 }
 0x132   : > { %v846_v46 = vrot.slane %v845_v10, 4  ;;  %v915_v48 = vadd.f32 %v914_v44, %v884_v43 }
 0x134   : > { %v847_v32 = vadd.f32 %v846_v46, %v845_v10  ;;  %v916_v49 = vrot.slane %v915_v48, 4 }
 0x136   : > { %v848_v51 = vrot.slane %v847_v32, 2  ;;  %v917_v52 = vadd.f32 %v916_v49, %v915_v48 }
 0x138   : > { %v849_v47 = vadd.f32 %v848_v51, %v847_v32  ;;  %v918_v53 = vrot.slane %v917_v52, 2 }
 0x13a   : > { %v850_v54 = vrot.slane %v849_v47, 1  ;;  %v919_v55 = vadd.f32 %v918_v53, %v917_v52 }
 0x13c   : > { %v851_v24 = vadd.f32 %v850_v54, %v849_v47  ;;  %v920_v56 = vrot.slane %v919_v55, 1 }
 0x13e   : > { %852 = vst [vmem:[%s282_s23] sm:$0x1] %v851_v24  ;;  %v921_v38 = vadd.f32 %v920_v56, %v919_v55 }
 0x140   : > { %922 = vst [vmem:[%s288_s26] sm:$0x1] %v921_v38 }
 0x141 PF: > { %s15_s17 = sadd.s32 1, %s1604_s17   ;;  %s1837_s15 = smov %s1600_s16 }
 0x142   : > { %p12_p6 = scmp.ge.s32.totalorder %s15_s17, 4   ;;  %s1838_s16 = smov %s1840_s18 }
 0x144   :  { %14 = sbr.rel (!%p12_p6) target bundleno = 2 (0x2), region = 94 }

</bundles_post_ra>
